<compile_context>
chip_gen: v6e
topology: v6e:2x2x1
jax: 0.10.0
libtpu: 0.0.40
codegen_flags: <defaults>
</compile_context>

<pallas_src>
import jax
import jax.numpy as jnp
from jax.experimental import pallas as pl
from jax.experimental.pallas import tpu as pltpu


def _round_up(v, m):
    return -(-v // m) * m


def _padded_vmem_bytes(shape, itemsize):
    """Rough VMEM footprint of a block, accounting for (8, 128) tile padding."""
    lead = 1
    for d in shape[:-2]:
        lead *= int(d)
    return lead * _round_up(int(shape[-2]), 8) * _round_up(int(shape[-1]), 128) * itemsize


def unfold_pallas(x, scale=1, ksize=None, padding=None):
    """Equivalent of Unfold(scale, ksize, padding).forward(x, rev=False)."""
    stride = scale
    k = ksize if ksize is not None else 3 * stride
    kH = kW = k
    pad = padding if padding is not None else stride

    B, C, H, W = x.shape
    Ho = (H + 2 * pad - kH) // stride + 1
    Wo = (W + 2 * pad - kW) // stride + 1
    assert Ho == H // stride and Wo == W // stride, (
        "Unfold parameterization must keep Ho == H//stride (as in the torch module)"
    )

    N = B * C
    kk = kH * kW
    Hp, Wp = H + 2 * pad, W + 2 * pad
    dtype = x.dtype
    itemsize = jnp.dtype(dtype).itemsize

    # ---- choose how many fused (batch*channel) planes to process per step ----
    per_plane = (
        2 * _padded_vmem_bytes((kk, Ho, Wo), itemsize)   # output block, double-buffered
        + 2 * _padded_vmem_bytes((H, W), itemsize)       # input block, double-buffered
        + _padded_vmem_bytes((Hp, Wp), itemsize)         # padded scratch (single)
    )
    target_vmem = 8 * 1024 * 1024                        # ~8 MiB / step: big DMAs, fits v7x
    nblk = max(1, min(N, target_vmem // max(per_plane, 1)))
    nblk = int(min(nblk, max(1, pl.cdiv(N, 2))))         # keep grid extent >= 2 (v7x megacore)
    grid = (pl.cdiv(N, nblk),)

    vmem_limit = int(min(max(2 * nblk * per_plane, 32 << 20), 48 << 20))

    def unfold_kernel(x_ref, o_ref, pad_scratch):
        # x_ref:       (nblk, H, W)        unpadded input planes
        # o_ref:       (nblk, kk, Ho, Wo)  extracted patches
        # pad_scratch: (nblk, Hp, Wp)      zero-padded copy built in VMEM
        if pad > 0:
            # Zero only the halo strips (interior is overwritten below).  Done
            # every step so correctness is independent of core/grid sharding.
            pad_scratch[:, :pad, :] = jnp.zeros((nblk, pad, Wp), dtype)
            pad_scratch[:, pad + H:, :] = jnp.zeros((nblk, pad, Wp), dtype)
            pad_scratch[:, :, :pad] = jnp.zeros((nblk, Hp, pad), dtype)
            pad_scratch[:, :, pad + W:] = jnp.zeros((nblk, Hp, pad), dtype)
        pad_scratch[:, pad:pad + H, pad:pad + W] = x_ref[...]

        for ki in range(kH):
            for kj in range(kW):
                j = ki * kW + kj
                # out[:, j, oh, ow] = x_pad[:, oh*stride + ki, ow*stride + kj]
                if stride == 1:
                    patch = pad_scratch[:, ki:ki + Ho, kj:kj + Wo]
                else:
                    # TODO(synk): for stride > 1 the lane-strided read lowers to a
                    # cross-lane gather; a wrapper-side W -> (W//stride, stride)
                    # reshape would turn it into a contiguous minor-dim select.
                    patch = pad_scratch[:, pl.ds(ki, Ho, stride=stride),
                                           pl.ds(kj, Wo, stride=stride)]
                o_ref[:, j, :, :] = patch

    out = pl.pallas_call(
        unfold_kernel,
        out_shape=jax.ShapeDtypeStruct((N, kk, Ho, Wo), dtype),
        grid=grid,
        in_specs=[pl.BlockSpec((nblk, H, W), lambda n: (n, 0, 0))],
        out_specs=pl.BlockSpec((nblk, kk, Ho, Wo), lambda n: (n, 0, 0, 0)),
        scratch_shapes=[pltpu.VMEM((nblk, Hp, Wp), dtype)],
        compiler_params=pltpu.CompilerParams(
            dimension_semantics=("parallel",),
            vmem_limit_bytes=vmem_limit,
        ),
        cost_estimate=pl.CostEstimate(
            flops=0,
            transcendentals=0,
            bytes_accessed=int((1 + kk) * N * H * W * itemsize),
        ),
    )(x.reshape(N, H, W))

    # (B*C, kk, Ho, Wo) -> (B, C*kk, H//stride, W//stride): contiguous merge, free.
    return out.reshape(B, C * kk, H // stride, W // stride)


def unfold_reference(x, scale=1, ksize=None, padding=None):
    """Pure-JAX reference matching torch F.unfold + reshape (for verification)."""
    stride = scale
    k = ksize if ksize is not None else 3 * stride
    kH = kW = k
    pad = padding if padding is not None else stride
    B, C, H, W = x.shape
    Ho = (H + 2 * pad - kH) // stride + 1
    Wo = (W + 2 * pad - kW) // stride + 1
    xp = jnp.pad(x, ((0, 0), (0, 0), (pad, pad), (pad, pad)))
    patches = jnp.stack(
        [
            xp[:, :, ki: ki + (Ho - 1) * stride + 1: stride,
                     kj: kj + (Wo - 1) * stride + 1: stride]
            for ki in range(kH)
            for kj in range(kW)
        ],
        axis=2,
    )  # (B, C, kH*kW, Ho, Wo)
    return patches.reshape(B, C * kH * kW, H // stride, W // stride)


# TODO(synk): rev=True path (F.fold overlap-add / average) is not kernelized;
# only the forward (rev=False) unfold hot path is implemented in Pallas.


if __name__ == "__main__":
    key = jax.random.PRNGKey(0)
    B, C, H, W = 2, 4, 16, 16
    x = jax.random.normal(key, (B, C, H, W), dtype=jnp.float32)

    out = unfold_pallas(x, scale=1)          # Unfold() defaults: stride=1, k=3, pad=1
    out = jax.block_until_ready(out)

    ref = unfold_reference(x, scale=1)
    assert out.shape == (B, C * 9, H, W), out.shape
    assert jnp.allclose(out, ref, atol=0.0, rtol=0.0), "mismatch vs reference"

    print("KERNEL_OK")
</pallas_src>

<mosaic_0001>
module attributes {stable_mosaic.version = 11 : i64} {
  func.func @unfold_kernel(%arg0: i32, %arg1: memref<4x16x16xf32, #tpu.memory_space<vmem>>, %arg2: memref<4x9x16x16xf32, #tpu.memory_space<vmem>>, %arg3: memref<4x18x18xf32, #tpu.memory_space<vmem>>) attributes {dimension_semantics = [#tpu.dimension_semantics<parallel>], iteration_bounds = array<i64: 2>, scalar_prefetch = 0 : i64, scratch_operands = 1 : i64, tpu.core_type = #tpu.core_type<tc>, window_params = [{transform_indices = @transform_0, window_bounds = array<i64: 4, 16, 16>}, {transform_indices = @transform_1, window_bounds = array<i64: 4, 9, 16, 16>}]} {
    %cst = arith.constant 0.000000e+00 : f32
    %0 = vector.broadcast %cst : f32 to vector<4x1x18xf32>
    %c0 = arith.constant 0 : index
    %c0_0 = arith.constant 0 : index
    %c0_1 = arith.constant 0 : index
    %1 = vector.load %arg3[%c0, %c0_0, %c0_1] : memref<4x18x18xf32, #tpu.memory_space<vmem>>, vector<4x1x18xf32>
    tpu.vector_store %arg3[%c0, %c0_0, %c0_1], %0 {strides = array<i32>} : memref<4x18x18xf32, #tpu.memory_space<vmem>>, vector<4x1x18xf32>,
    %cst_2 = arith.constant 0.000000e+00 : f32
    %2 = vector.broadcast %cst_2 : f32 to vector<4x1x18xf32>
    %c0_3 = arith.constant 0 : index
    %c17 = arith.constant 17 : index
    %c0_4 = arith.constant 0 : index
    %3 = vector.load %arg3[%c0_3, %c17, %c0_4] : memref<4x18x18xf32, #tpu.memory_space<vmem>>, vector<4x1x18xf32>
    tpu.vector_store %arg3[%c0_3, %c17, %c0_4], %2 {strides = array<i32>} : memref<4x18x18xf32, #tpu.memory_space<vmem>>, vector<4x1x18xf32>,
    %cst_5 = arith.constant 0.000000e+00 : f32
    %4 = vector.broadcast %cst_5 : f32 to vector<4x18x1xf32>
    %c0_6 = arith.constant 0 : index
    %c0_7 = arith.constant 0 : index
    %c0_8 = arith.constant 0 : index
    %5 = vector.load %arg3[%c0_6, %c0_7, %c0_8] : memref<4x18x18xf32, #tpu.memory_space<vmem>>, vector<4x18x1xf32>
    tpu.vector_store %arg3[%c0_6, %c0_7, %c0_8], %4 {strides = array<i32>} : memref<4x18x18xf32, #tpu.memory_space<vmem>>, vector<4x18x1xf32>,
    %cst_9 = arith.constant 0.000000e+00 : f32
    %6 = vector.broadcast %cst_9 : f32 to vector<4x18x1xf32>
    %c0_10 = arith.constant 0 : index
    %c0_11 = arith.constant 0 : index
    %c17_12 = arith.constant 17 : index
    %7 = vector.load %arg3[%c0_10, %c0_11, %c17_12] : memref<4x18x18xf32, #tpu.memory_space<vmem>>, vector<4x18x1xf32>
    tpu.vector_store %arg3[%c0_10, %c0_11, %c17_12], %6 {strides = array<i32>} : memref<4x18x18xf32, #tpu.memory_space<vmem>>, vector<4x18x1xf32>,
    %c0_13 = arith.constant 0 : index
    %c0_14 = arith.constant 0 : index
    %c0_15 = arith.constant 0 : index
    %8 = vector.load %arg1[%c0_13, %c0_14, %c0_15] : memref<4x16x16xf32, #tpu.memory_space<vmem>>, vector<4x16x16xf32>
    %c0_16 = arith.constant 0 : index
    %c1 = arith.constant 1 : index
    %c1_17 = arith.constant 1 : index
    %9 = vector.load %arg3[%c0_16, %c1, %c1_17] : memref<4x18x18xf32, #tpu.memory_space<vmem>>, vector<4x16x16xf32>
    tpu.vector_store %arg3[%c0_16, %c1, %c1_17], %8 {strides = array<i32>} : memref<4x18x18xf32, #tpu.memory_space<vmem>>, vector<4x16x16xf32>,
    %c0_18 = arith.constant 0 : index
    %c0_19 = arith.constant 0 : index
    %c0_20 = arith.constant 0 : index
    %10 = vector.load %arg3[%c0_18, %c0_19, %c0_20] : memref<4x18x18xf32, #tpu.memory_space<vmem>>, vector<4x16x16xf32>
    %c0_21 = arith.constant 0 : index
    %c0_22 = arith.constant 0 : index
    %c0_23 = arith.constant 0 : index
    %c0_24 = arith.constant 0 : index
    %11 = vector.load %arg2[%c0_21, %c0_22, %c0_23, %c0_24] : memref<4x9x16x16xf32, #tpu.memory_space<vmem>>, vector<4x1x16x16xf32>
    %12 = vector.shape_cast %11 : vector<4x1x16x16xf32> to vector<4x16x16xf32>
    %13 = vector.shape_cast %10 : vector<4x16x16xf32> to vector<4x1x16x16xf32>
    tpu.vector_store %arg2[%c0_21, %c0_22, %c0_23, %c0_24], %13 {strides = array<i32>} : memref<4x9x16x16xf32, #tpu.memory_space<vmem>>, vector<4x1x16x16xf32>,
    %c0_25 = arith.constant 0 : index
    %c0_26 = arith.constant 0 : index
    %c1_27 = arith.constant 1 : index
    %14 = vector.load %arg3[%c0_25, %c0_26, %c1_27] : memref<4x18x18xf32, #tpu.memory_space<vmem>>, vector<4x16x16xf32>
    %c0_28 = arith.constant 0 : index
    %c1_29 = arith.constant 1 : index
    %c0_30 = arith.constant 0 : index
    %c0_31 = arith.constant 0 : index
    %15 = vector.load %arg2[%c0_28, %c1_29, %c0_30, %c0_31] : memref<4x9x16x16xf32, #tpu.memory_space<vmem>>, vector<4x1x16x16xf32>
    %16 = vector.shape_cast %15 : vector<4x1x16x16xf32> to vector<4x16x16xf32>
    %17 = vector.shape_cast %14 : vector<4x16x16xf32> to vector<4x1x16x16xf32>
    tpu.vector_store %arg2[%c0_28, %c1_29, %c0_30, %c0_31], %17 {strides = array<i32>} : memref<4x9x16x16xf32, #tpu.memory_space<vmem>>, vector<4x1x16x16xf32>,
    %c0_32 = arith.constant 0 : index
    %c0_33 = arith.constant 0 : index
    %c2 = arith.constant 2 : index
    %18 = vector.load %arg3[%c0_32, %c0_33, %c2] : memref<4x18x18xf32, #tpu.memory_space<vmem>>, vector<4x16x16xf32>
    %c0_34 = arith.constant 0 : index
    %c2_35 = arith.constant 2 : index
    %c0_36 = arith.constant 0 : index
    %c0_37 = arith.constant 0 : index
    %19 = vector.load %arg2[%c0_34, %c2_35, %c0_36, %c0_37] : memref<4x9x16x16xf32, #tpu.memory_space<vmem>>, vector<4x1x16x16xf32>
    %20 = vector.shape_cast %19 : vector<4x1x16x16xf32> to vector<4x16x16xf32>
    %21 = vector.shape_cast %18 : vector<4x16x16xf32> to vector<4x1x16x16xf32>
    tpu.vector_store %arg2[%c0_34, %c2_35, %c0_36, %c0_37], %21 {strides = array<i32>} : memref<4x9x16x16xf32, #tpu.memory_space<vmem>>, vector<4x1x16x16xf32>,
    %c0_38 = arith.constant 0 : index
    %c1_39 = arith.constant 1 : index
    %c0_40 = arith.constant 0 : index
    %22 = vector.load %arg3[%c0_38, %c1_39, %c0_40] : memref<4x18x18xf32, #tpu.memory_space<vmem>>, vector<4x16x16xf32>
    %c0_41 = arith.constant 0 : index
    %c3 = arith.constant 3 : index
    %c0_42 = arith.constant 0 : index
    %c0_43 = arith.constant 0 : index
    %23 = vector.load %arg2[%c0_41, %c3, %c0_42, %c0_43] : memref<4x9x16x16xf32, #tpu.memory_space<vmem>>, vector<4x1x16x16xf32>
    %24 = vector.shape_cast %23 : vector<4x1x16x16xf32> to vector<4x16x16xf32>
    %25 = vector.shape_cast %22 : vector<4x16x16xf32> to vector<4x1x16x16xf32>
    tpu.vector_store %arg2[%c0_41, %c3, %c0_42, %c0_43], %25 {strides = array<i32>} : memref<4x9x16x16xf32, #tpu.memory_space<vmem>>, vector<4x1x16x16xf32>,
    %c0_44 = arith.constant 0 : index
    %c1_45 = arith.constant 1 : index
    %c1_46 = arith.constant 1 : index
    %26 = vector.load %arg3[%c0_44, %c1_45, %c1_46] : memref<4x18x18xf32, #tpu.memory_space<vmem>>, vector<4x16x16xf32>
    %c0_47 = arith.constant 0 : index
    %c4 = arith.constant 4 : index
    %c0_48 = arith.constant 0 : index
    %c0_49 = arith.constant 0 : index
    %27 = vector.load %arg2[%c0_47, %c4, %c0_48, %c0_49] : memref<4x9x16x16xf32, #tpu.memory_space<vmem>>, vector<4x1x16x16xf32>
    %28 = vector.shape_cast %27 : vector<4x1x16x16xf32> to vector<4x16x16xf32>
    %29 = vector.shape_cast %26 : vector<4x16x16xf32> to vector<4x1x16x16xf32>
    tpu.vector_store %arg2[%c0_47, %c4, %c0_48, %c0_49], %29 {strides = array<i32>} : memref<4x9x16x16xf32, #tpu.memory_space<vmem>>, vector<4x1x16x16xf32>,
    %c0_50 = arith.constant 0 : index
    %c1_51 = arith.constant 1 : index
    %c2_52 = arith.constant 2 : index
    %30 = vector.load %arg3[%c0_50, %c1_51, %c2_52] : memref<4x18x18xf32, #tpu.memory_space<vmem>>, vector<4x16x16xf32>
    %c0_53 = arith.constant 0 : index
    %c5 = arith.constant 5 : index
    %c0_54 = arith.constant 0 : index
    %c0_55 = arith.constant 0 : index
    %31 = vector.load %arg2[%c0_53, %c5, %c0_54, %c0_55] : memref<4x9x16x16xf32, #tpu.memory_space<vmem>>, vector<4x1x16x16xf32>
    %32 = vector.shape_cast %31 : vector<4x1x16x16xf32> to vector<4x16x16xf32>
    %33 = vector.shape_cast %30 : vector<4x16x16xf32> to vector<4x1x16x16xf32>
    tpu.vector_store %arg2[%c0_53, %c5, %c0_54, %c0_55], %33 {strides = array<i32>} : memref<4x9x16x16xf32, #tpu.memory_space<vmem>>, vector<4x1x16x16xf32>,
    %c0_56 = arith.constant 0 : index
    %c2_57 = arith.constant 2 : index
    %c0_58 = arith.constant 0 : index
    %34 = vector.load %arg3[%c0_56, %c2_57, %c0_58] : memref<4x18x18xf32, #tpu.memory_space<vmem>>, vector<4x16x16xf32>
    %c0_59 = arith.constant 0 : index
    %c6 = arith.constant 6 : index
    %c0_60 = arith.constant 0 : index
    %c0_61 = arith.constant 0 : index
    %35 = vector.load %arg2[%c0_59, %c6, %c0_60, %c0_61] : memref<4x9x16x16xf32, #tpu.memory_space<vmem>>, vector<4x1x16x16xf32>
    %36 = vector.shape_cast %35 : vector<4x1x16x16xf32> to vector<4x16x16xf32>
    %37 = vector.shape_cast %34 : vector<4x16x16xf32> to vector<4x1x16x16xf32>
    tpu.vector_store %arg2[%c0_59, %c6, %c0_60, %c0_61], %37 {strides = array<i32>} : memref<4x9x16x16xf32, #tpu.memory_space<vmem>>, vector<4x1x16x16xf32>,
    %c0_62 = arith.constant 0 : index
    %c2_63 = arith.constant 2 : index
    %c1_64 = arith.constant 1 : index
    %38 = vector.load %arg3[%c0_62, %c2_63, %c1_64] : memref<4x18x18xf32, #tpu.memory_space<vmem>>, vector<4x16x16xf32>
    %c0_65 = arith.constant 0 : index
    %c7 = arith.constant 7 : index
    %c0_66 = arith.constant 0 : index
    %c0_67 = arith.constant 0 : index
    %39 = vector.load %arg2[%c0_65, %c7, %c0_66, %c0_67] : memref<4x9x16x16xf32, #tpu.memory_space<vmem>>, vector<4x1x16x16xf32>
    %40 = vector.shape_cast %39 : vector<4x1x16x16xf32> to vector<4x16x16xf32>
    %41 = vector.shape_cast %38 : vector<4x16x16xf32> to vector<4x1x16x16xf32>
    tpu.vector_store %arg2[%c0_65, %c7, %c0_66, %c0_67], %41 {strides = array<i32>} : memref<4x9x16x16xf32, #tpu.memory_space<vmem>>, vector<4x1x16x16xf32>,
    %c0_68 = arith.constant 0 : index
    %c2_69 = arith.constant 2 : index
    %c2_70 = arith.constant 2 : index
    %42 = vector.load %arg3[%c0_68, %c2_69, %c2_70] : memref<4x18x18xf32, #tpu.memory_space<vmem>>, vector<4x16x16xf32>
    %c0_71 = arith.constant 0 : index
    %c8 = arith.constant 8 : index
    %c0_72 = arith.constant 0 : index
    %c0_73 = arith.constant 0 : index
    %43 = vector.load %arg2[%c0_71, %c8, %c0_72, %c0_73] : memref<4x9x16x16xf32, #tpu.memory_space<vmem>>, vector<4x1x16x16xf32>
    %44 = vector.shape_cast %43 : vector<4x1x16x16xf32> to vector<4x16x16xf32>
    %45 = vector.shape_cast %42 : vector<4x16x16xf32> to vector<4x1x16x16xf32>
    tpu.vector_store %arg2[%c0_71, %c8, %c0_72, %c0_73], %45 {strides = array<i32>} : memref<4x9x16x16xf32, #tpu.memory_space<vmem>>, vector<4x1x16x16xf32>,
    return
  }
  func.func @transform_0(%arg0: i32) -> (i32, i32, i32) {
    %c0_i32 = arith.constant 0 : i32
    %c0_i32_0 = arith.constant 0 : i32
    %c0_i32_1 = arith.constant 0 : i32
    return %arg0, %c0_i32, %c0_i32_0 : i32, i32, i32
  }
  func.func @transform_1(%arg0: i32) -> (i32, i32, i32, i32) {
    %c0_i32 = arith.constant 0 : i32
    %c0_i32_0 = arith.constant 0 : i32
    %c0_i32_1 = arith.constant 0 : i32
    %c0_i32_2 = arith.constant 0 : i32
    return %arg0, %c0_i32, %c0_i32_0, %c0_i32_1 : i32, i32, i32, i32
  }
}

</mosaic_0001>

<bundles_post_ra>
// kernel: tpu_custom_call.1
= control target key start
LH: loop header
LB: loop body
LE: loop exit
PB: predicated region body
PF: predicated region fallthrough
CT: control target
= control target key end

     0   :  { %6 = vsyncpa [#allocation4], 0  ;;  %s1336_s0 = inlined_call_operand.hbm [shape: f32[8,16,16], index: 0, kind: input, shape index: {}]   ;;  %s1337_s1 = inlined_call_operand.hbm [shape: f32[8,9,16,16], index: 1, kind: output, shape index: {}]  }
   0x1   :  { %8 = vsyncpa [#allocation4 + $0x1], 0 }
   0x2   :  { %9 = vsyncpa [#allocation5], 0 }
   0x3   :  { %11 = vsyncpa [#allocation5 + $0x1], 0  ;;  %s907_s6 = smov 0   ;;  %s909_s7 = smov 0  }
   0x4   :  { %s911_s8 = smov 0   ;;  %s913_s9 = smov 0  }
   0x5 LB: > { %s928_s10 = sadd.s32 4294967295, %s885_s9   ;;  %s657_s11 = sadd.s32 4294967294, %s885_s9   ;;  %s885_s9 = sphi %s913_s9, %s1352_s9   ;;  %s881_s8 = sphi %s911_s8, %s1351_s8   ;;  %s877_s7 = sphi %s909_s7, %s1350_s7   ;;  %s873_s6 = sphi %s907_s6, %s1349_s6  }
   0x6   : > { %s932_s12 = sadd.s32 1, %s885_s9   ;;  %s24_s13 = sadd.s32 1, %s881_s8 }
   0x7   : > { %s21_s14 = ssub.s32 %s885_s9, %s932_s12  ;;  %p31_p0 = scmp.ne.s32.totalorder %s881_s8, %s877_s7 }
   0x8   : > { %p22_p1 = scmp.eq.s32.totalorder %s21_s14, 0  ;;  %p32_p2 = scmp.eq.s32.totalorder %s885_s9, 0 }
   0x9   : > { %p37_p3 = scmp.ne.s32.totalorder %s877_s7, %s873_s6  ;;  %p38_p4 = scmp.eq.s32.totalorder %s928_s10, 0 }
   0xa   : > { %s944_s15 = scalar_select %p22_p1, %s881_s8, %s24_s13  }
   0xb   : > { %p946_p5 = por %p32_p2, %p31_p0  ;;  %p950_p6 = por %p38_p4, %p37_p3 }
   0xc   : > { %p61_p7 = scmp.eq.s32.totalorder %s928_s10, 1  ;;  %p67_p8 = scmp.eq.s32.totalorder %s657_s11, 1 }
   0xd   : > { %s1341_s17 = scalar_select %p950_p6, 1, 0 }
   0xe   : > { %p751_p10 = scmp.lt.s32.totalorder %s885_s9, 2  ;;  %p957_p11 = por %p61_p7, %p31_p0 }
   0xf   : > { %p961_p12 = por %p67_p8, %p37_p3  ;;  %s87_s20 = sand.u32 1, %s881_s8  }
  0x10   : > { %s1342_s18 = scalar_select %p957_p11, 1, 0 }
  0x11   : > { %s1343_s19 = scalar_select %p961_p12, 1, 0 }
  0x12   : > { %s736_s21 = sshll.u32 %s885_s9, 10  ;;  %s660_s22 = sshll.u32 %s87_s20, 6 }
  0x13   : > { %s970_s25 = scalar_lea.hbm %s1336_s0, %s736_s21  ;;  %s91_s26 = scalar_lea.vmem [#allocation3], %s660_s22 }
  0x14   : > { %s99_s27 = sshll.u32 %s91_s26, 4  ;;  %p974_p13 = pnand %p751_p10, %p946_p5  ;;  %s978_s27 = int_to_ptr.vmem [resolvable:$true] %s99_s27 }
  0x15   : > { %s980_s29 = scalar_lea.sflag [#allocation4], %s87_s20  ;;  %s793_s30 = scalar_lea.hbm %s970_s25, 1024 }
  0x16   : > { %p794_p0 = scmp.ne.s32.totalorder %s970_s25, %s793_s30  ;;  %p795_p1 = pneg %p974_p13 }
  0x17   : > { %s798_s4 = scalar_lea.hbm %s1336_s0, 2048  ;;  %p799_p4 = scmp.lt.s32.totalorder %s970_s25, %s1336_s0 }
  0x18   : > { %p796_p2 = pnand %p795_p1, %p794_p0  ;;  %p800_p5 = scmp.lt.s32.totalorder %s798_s4, %s793_s30 }
  0x1a   : > { %p797_p3 = pneg %p796_p2  ;;  %p801_p7 = por %p800_p5, %p799_p4 }
  0x1c   : > { %p802_p8 = pnand %p801_p7, %p797_p3 }
  0x1e   : > { %805 = shalt.err (!%p802_p8)
}
  0x1f   : > { %s806_s13 = scalar_lea.vmem %s978_s27, 1024  ;;  %s887_s14 = smov [#allocation3]  }
  0x20   : > { %p807_p10 = scmp.ne.s32.totalorder %s978_s27, %s806_s13  ;;  %s811_s16 = sshll.u32 %s887_s14, 4  ;;  %s812_s16 = int_to_ptr.vmem [resolvable:$false] %s811_s16 }
  0x21   : > { %s813_s20 = scalar_lea.vmem %s812_s16, 2048  ;;  %p814_p2 = scmp.lt.s32.totalorder %s978_s27, %s812_s16 }
  0x22   : > { %p809_p9 = pnand %p807_p10, %p795_p1  ;;  %p815_p12 = scmp.lt.s32.totalorder %s813_s20, %s806_s13 }
  0x24   : > { %p810_p0 = pneg %p809_p9  ;;  %p816_p11 = por %p815_p12, %p814_p2 }
  0x26   : > { %p817_p6 = pnand %p816_p11, %p810_p0 }
  0x28   : > { %820 = shalt.err (!%p817_p6)
}
  0x29   : > { %s888_s21 = smov 128   ;;  %s889_s22 = smov 8  }
  0x2a   : > { %746 = dma.hbm_to_vmem [thread:$0]  (!%p974_p13), %s970_s25, 1024, %s978_s27, %s980_s29, %s888_s21, %s888_s21, %s889_s22  }
  0x2b   : > { %p664_p9 = scmp.ge.s32.totalorder %s885_s9, 1  ;;  %p107_p1 = scmp.lt.s32.totalorder %s885_s9, 3 }
  0x2d   : > { %p108_p3 = pnand %p664_p9, %p107_p1 }
  0x2e   : > { %s1004_s23 = sand.u32 (!%p108_p3), 1, %s877_s7   ;;  %p1345_p6 = scmp.ne.s32.totalorder (!%p108_p3), %s1341_s17, 0 }
  0x2f   : > { %111 = sbr.rel (%p108_p3) target bundleno = 404 (0x194), region = 24  ;;  %s665_s24 = sshll.u32 (!%p108_p3), %s1004_s23, 6 }
  0x30   : > { %s114_s26 = scalar_lea.sflag (!%p108_p3), [#allocation4], %s1004_s23  ;;  %s1008_s30 = scalar_lea.vmem (!%p108_p3), [#allocation3], %s665_s24 }
  0x34   : > { %864 = dma.done.wait (%p1345_p6), %s114_s26, 1024  }
  0x35   : > { %866 = vsyncadd (%p1345_p6), %s114_s26, 4294966272  ;;  %vm138_vm0 = vcmask 139264   ;;  %vm147_vm1 = vcmask 7168   ;;  %vm161_vm2 = vcmask 146568   ;;  %v890_v0 = vmov 0.0   ;;  %v177_v1 = vld [vmem:[%s1008_s30 + $0x10] sm:$0xff] }
  0x36   : > { %140 = vst.msk [vmem:[#allocation2 + $0x18] sm:$0x1] %vm138_vm0, %v890_v0  ;;  %139 = vst.msk [vmem:[#allocation2] sm:$0x1] %vm138_vm0, %v890_v0  ;;  %vm150_vm3 = vcmask 1024   ;;  %vm164_vm4 = vcmask 140424  }
  0x37   : > { %153 = vst.msk [vmem:[#allocation2 + $0x20] sm:$0xff] %vm147_vm1, %v890_v0  ;;  %149 = vst.msk [vmem:[#allocation2 + $0x8] sm:$0xff] %vm147_vm1, %v890_v0  ;;  %v175_v2 = vld [vmem:[%s1008_s30] sm:$0xff]  ;;  %s891_s17 = smov 1   ;;  %v178_v3 = vld [vmem:[%s1008_s30 + $0x18] sm:$0xff]  ;;  %vm215_vm5 = vcmask 138248  }
  0x38   : > { %141 = vst.msk [vmem:[#allocation2 + $0x30] sm:$0x1] %vm138_vm0, %v890_v0  ;;  %142 = vst.msk [vmem:[#allocation2 + $0x48] sm:$0x1] %vm138_vm0, %v890_v0  ;;  %195 = vrot.lane.b32.xlu1 %v177_v1, %s891_s17  ;;  %191 = vrot.lane.b32.xlu0 %v175_v2, %s891_s17  ;;  %v176_v4 = vld [vmem:[%s1008_s30 + $0x8] sm:$0xff]  ;;  %v179_v5 = vld [vmem:[%s1008_s30 + $0x20] sm:$0xff] }
  0x39   : > { %143 = vst.msk [vmem:[#allocation2 + $0x11] sm:$0x1] %vm138_vm0, %v890_v0  ;;  %144 = vst.msk [vmem:[#allocation2 + $0x29] sm:$0x1] %vm138_vm0, %v890_v0  ;;  %v180_v6 = vld [vmem:[%s1008_s30 + $0x28] sm:$0xff]  ;;  %v181_v7 = vld [vmem:[%s1008_s30 + $0x30] sm:$0xff] }
  0x3a   : > { %145 = vst.msk [vmem:[#allocation2 + $0x41] sm:$0x1] %vm138_vm0, %v890_v0  ;;  %146 = vst.msk [vmem:[#allocation2 + $0x59] sm:$0x1] %vm138_vm0, %v890_v0  ;;  %v182_v8 = vld [vmem:[%s1008_s30 + $0x38] sm:$0xff]  ;;  %s737_s25 = smul.u32 576, %s1004_s23 }
  0x3b   : > { %156 = vst.msk [vmem:[#allocation2 + $0x38] sm:$0xff] %vm147_vm1, %v890_v0  ;;  %159 = vst.msk [vmem:[#allocation2 + $0x50] sm:$0xff] %vm147_vm1, %v890_v0  ;;  %vm232_vm6 = vcmask 130048   ;;  %s892_s28 = smov 127   ;;  %s893_s29 = smov 126  }
  0x3c   : > { %152 = vst.msk [vmem:[#allocation2 + $0x18] sm:$0xff] %vm147_vm1, %v890_v0  ;;  %148 = vst.msk [vmem:[#allocation2] sm:$0xff] %vm147_vm1, %v890_v0  ;;  %197 = vrot.lane.b32.xlu1 %v178_v3, %s891_s17  ;;  %193 = vrot.lane.b32.xlu0 %v176_v4, %s891_s17  ;;  %s1049_s27 = scalar_lea.vmem [#allocation6], %s737_s25  ;;  %s738_s2 = smul.u32 9216, %s928_s10 }
  0x3d   : > { %167 = vst.msk [vmem:[#allocation2 + $0x20] sm:$0xff] %vm161_vm2, %v890_v0  ;;  %163 = vst.msk [vmem:[#allocation2 + $0x8] sm:$0xff] %vm161_vm2, %v890_v0  ;;  %s584_s3 = sshll.u32 %s1049_s27, 4  ;;  %s570_s10 = scalar_lea.sflag [#allocation5], %s1004_s23  ;;  %s1291_s3 = int_to_ptr.vmem [resolvable:$true] %s584_s3 }
  0x3e   : > { %155 = vst.msk [vmem:[#allocation2 + $0x30] sm:$0xff] %vm147_vm1, %v890_v0  ;;  %158 = vst.msk [vmem:[#allocation2 + $0x48] sm:$0xff] %vm147_vm1, %v890_v0  ;;  %s1289_s11 = scalar_lea.hbm %s1337_s1, %s738_s2  ;;  %s821_s13 = scalar_lea.vmem %s1291_s3, 9216 }
  0x3f   : > { %170 = vst.msk [vmem:[#allocation2 + $0x38] sm:$0xff] %vm161_vm2, %v890_v0  ;;  %173 = vst.msk [vmem:[#allocation2 + $0x50] sm:$0xff] %vm161_vm2, %v890_v0  ;;  %p822_p11 = scmp.ne.s32.totalorder %s1291_s3, %s821_s13  ;;  %p1346_p12 = scmp.ne.s32.totalorder %s1342_s18, 0 }
  0x40   : > { %154 = vst.msk [vmem:[#allocation2 + $0x28] sm:$0x3] %vm150_vm3, %v890_v0  ;;  %151 = vst.msk [vmem:[#allocation2 + $0x10] sm:$0x3] %vm150_vm3, %v890_v0  ;;  %199 = vrot.lane.b32.xlu0 %v179_v5, %s891_s17  ;;  %201 = vrot.lane.b32.xlu1 %v180_v6, %s891_s17  ;;  %s894_s14 = smov [#allocation6]  }
  0x41   : > { %157 = vst.msk [vmem:[#allocation2 + $0x40] sm:$0x3] %vm150_vm3, %v890_v0  ;;  %160 = vst.msk [vmem:[#allocation2 + $0x58] sm:$0x3] %vm150_vm3, %v890_v0  ;;  %p823_p13 = pnand %p822_p11, %p1346_p12  ;;  %s825_s16 = sshll.u32 %s894_s14, 4  ;;  %s826_s16 = int_to_ptr.vmem [resolvable:$false] %s825_s16 }
  0x42   : > { %166 = vst.msk [vmem:[#allocation2 + $0x18] sm:$0xff] %vm161_vm2, %v890_v0  ;;  %162 = vst.msk [vmem:[#allocation2] sm:$0xff] %vm161_vm2, %v890_v0  ;;  %s827_s20 = scalar_lea.vmem %s826_s16, 18432  ;;  %p828_p5 = scmp.lt.s32.totalorder %s1291_s3, %s826_s16 }
  0x43   : > { %168 = vst.msk [vmem:[#allocation2 + $0x28] sm:$0x3] %vm164_vm4, %v890_v0  ;;  %165 = vst.msk [vmem:[#allocation2 + $0x10] sm:$0x3] %vm164_vm4, %v890_v0  ;;  %p824_p4 = pneg %p823_p13  ;;  %p829_p7 = scmp.lt.s32.totalorder %s827_s20, %s821_s13 }
  0x44   : > { %169 = vst.msk [vmem:[#allocation2 + $0x30] sm:$0xff] %vm161_vm2, %v890_v0  ;;  %172 = vst.msk [vmem:[#allocation2 + $0x48] sm:$0xff] %vm161_vm2, %v890_v0  ;;  %203 = vrot.lane.b32.xlu0 %v181_v7, %s891_s17  ;;  %205 = vrot.lane.b32.xlu1 %v182_v8, %s891_s17 }
  0x45   : > { %171 = vst.msk [vmem:[#allocation2 + $0x40] sm:$0x3] %vm164_vm4, %v890_v0  ;;  %174 = vst.msk [vmem:[#allocation2 + $0x58] sm:$0x3] %vm164_vm4, %v890_v0  ;;  %p830_p8 = por %p829_p7, %p828_p5 }
  0x47   : > { %p831_p10 = pnand %p830_p8, %p824_p4 }
  0xaa   : > { %v196_v9 = vpop.permute.xlu1 %195  ;;  %v192_v10 = vpop.permute.xlu0 %191 }
  0xab   : > { %218 = vst.msk [vmem:[#allocation2 + $0x19] sm:$0xff] %vm215_vm5, %v196_v9  ;;  %216 = vst.msk [vmem:[#allocation2 + $0x1] sm:$0xff] %vm215_vm5, %v192_v10 }
  0xae   : > { %v198_v11 = vpop.permute.xlu1 %197  ;;  %v194_v12 = vpop.permute.xlu0 %193 }
  0xaf   : > { %219 = vst.msk [vmem:[#allocation2 + $0x21] sm:$0xff] %vm215_vm5, %v198_v11  ;;  %217 = vst.msk [vmem:[#allocation2 + $0x9] sm:$0xff] %vm215_vm5, %v194_v12 }
  0xb2   : > { %v1043_v13 = vld [vmem:[#allocation2 + $0x18] sm:$0xff]  ;;  %v1047_v15 = vld [vmem:[#allocation2] sm:$0xff]  ;;  %v200_v16 = vpop.permute.xlu0 %199  ;;  %v202_v17 = vpop.permute.xlu1 %201 }
  0xb3   : > { %v1045_v14 = vld [vmem:[#allocation2 + $0x19] sm:$0xff]  ;;  %235 = vst.msk [vmem:[%s1049_s27 + $0x90] sm:$0xff] %vm232_vm6, %v1043_v13  ;;  %233 = vst.msk [vmem:[%s1049_s27] sm:$0xff] %vm232_vm6, %v1047_v15  ;;  %v1060_v18 = vld [vmem:[#allocation2 + $0x1] sm:$0xff]  ;;  %257 = vrot.lane.b32.xlu0 %v1047_v15, %s892_s28 }
  0xb4   : > { %684 = vst.msk [vmem:[%s1049_s27 + $0xc0] sm:$0xff] %vm232_vm6, %v1045_v14  ;;  %682 = vst.msk [vmem:[%s1049_s27 + $0x30] sm:$0xff] %vm232_vm6, %v1060_v18 }
  0xb5   : > { %220 = vst.msk [vmem:[#allocation2 + $0x31] sm:$0xff] %vm215_vm5, %v200_v16  ;;  %221 = vst.msk [vmem:[#allocation2 + $0x39] sm:$0xff] %vm215_vm5, %v202_v17 }
  0xb6   : > { %v227_v19 = vld [vmem:[#allocation2 + $0x20] sm:$0xff]  ;;  %v204_v22 = vpop.permute.xlu0 %203  ;;  %v206_v23 = vpop.permute.xlu1 %205  ;;  %v225_v25 = vld [vmem:[#allocation2 + $0x8] sm:$0xff] }
  0xb7   : > { %v1069_v20 = vld [vmem:[#allocation2 + $0x21] sm:$0xff]  ;;  %236 = vst.msk [vmem:[%s1049_s27 + $0x98] sm:$0xff] %vm232_vm6, %v227_v19  ;;  %v340_v26 = vld [vmem:[#allocation2 + $0x9] sm:$0xff]  ;;  %261 = vrot.lane.b32.xlu0 %v1043_v13, %s892_s28  ;;  %234 = vst.msk [vmem:[%s1049_s27 + $0x8] sm:$0xff] %vm232_vm6, %v225_v25  ;;  %259 = vrot.lane.b32.xlu1 %v225_v25, %s892_s28 }
  0xb8   : > { %v1071_v21 = vld [vmem:[#allocation2 + $0x1a] sm:$0xff]  ;;  %685 = vst.msk [vmem:[%s1049_s27 + $0xc8] sm:$0xff] %vm232_vm6, %v1069_v20  ;;  %v1078_v24 = vld [vmem:[#allocation2 + $0x22] sm:$0xff]  ;;  %683 = vst.msk [vmem:[%s1049_s27 + $0x38] sm:$0xff] %vm232_vm6, %v340_v26 }
  0xb9   : > { %708 = vst.msk [vmem:[%s1049_s27 + $0xf0] sm:$0xff] %vm232_vm6, %v1071_v21  ;;  %709 = vst.msk [vmem:[%s1049_s27 + $0xf8] sm:$0xff] %vm232_vm6, %v1078_v24  ;;  %v1094_v27 = vld [vmem:[#allocation2 + $0x2] sm:$0xff]  ;;  %v1096_v28 = vld [vmem:[#allocation2 + $0xa] sm:$0xff] }
  0xba   : > { %222 = vst.msk [vmem:[#allocation2 + $0x49] sm:$0xff] %vm215_vm5, %v204_v22  ;;  %223 = vst.msk [vmem:[#allocation2 + $0x51] sm:$0xff] %vm215_vm5, %v206_v23 }
  0xbb   : > { %706 = vst.msk [vmem:[%s1049_s27 + $0x60] sm:$0xff] %vm232_vm6, %v1094_v27  ;;  %707 = vst.msk [vmem:[%s1049_s27 + $0x68] sm:$0xff] %vm232_vm6, %v1096_v28  ;;  %263 = vrot.lane.b32.xlu1 %v227_v19, %s892_s28 }
  0xbc   : > { %v228_v29 = vld [vmem:[#allocation2 + $0x30] sm:$0xff]  ;;  %v229_v31 = vld [vmem:[#allocation2 + $0x38] sm:$0xff] }
  0xbd   : > { %v343_v30 = vld [vmem:[#allocation2 + $0x31] sm:$0xff]  ;;  %237 = vst.msk [vmem:[%s1049_s27 + $0x120] sm:$0xff] %vm232_vm6, %v228_v29  ;;  %238 = vst.msk [vmem:[%s1049_s27 + $0x128] sm:$0xff] %vm232_vm6, %v229_v31  ;;  %v344_v32 = vld [vmem:[#allocation2 + $0x39] sm:$0xff]  ;;  %265 = vrot.lane.b32.xlu0 %v228_v29, %s892_s28 }
  0xbe   : > { %686 = vst.msk [vmem:[%s1049_s27 + $0x150] sm:$0xff] %vm232_vm6, %v343_v30  ;;  %v458_v33 = vld [vmem:[#allocation2 + $0x32] sm:$0xff]  ;;  %v459_v34 = vld [vmem:[#allocation2 + $0x3a] sm:$0xff]  ;;  %687 = vst.msk [vmem:[%s1049_s27 + $0x158] sm:$0xff] %vm232_vm6, %v344_v32 }
  0xbf   : > { %710 = vst.msk [vmem:[%s1049_s27 + $0x180] sm:$0xff] %vm232_vm6, %v458_v33  ;;  %711 = vst.msk [vmem:[%s1049_s27 + $0x188] sm:$0xff] %vm232_vm6, %v459_v34  ;;  %267 = vrot.lane.b32.xlu1 %v229_v31, %s892_s28 }
  0xc1   : > { %v230_v35 = vld [vmem:[#allocation2 + $0x48] sm:$0xff]  ;;  %v231_v37 = vld [vmem:[#allocation2 + $0x50] sm:$0xff] }
  0xc2   : > { %v345_v36 = vld [vmem:[#allocation2 + $0x49] sm:$0xff]  ;;  %239 = vst.msk [vmem:[%s1049_s27 + $0x1b0] sm:$0xff] %vm232_vm6, %v230_v35  ;;  %240 = vst.msk [vmem:[%s1049_s27 + $0x1b8] sm:$0xff] %vm232_vm6, %v231_v37  ;;  %v346_v38 = vld [vmem:[#allocation2 + $0x51] sm:$0xff]  ;;  %269 = vrot.lane.b32.xlu0 %v230_v35, %s892_s28 }
  0xc3   : > { %688 = vst.msk [vmem:[%s1049_s27 + $0x1e0] sm:$0xff] %vm232_vm6, %v345_v36  ;;  %v460_v39 = vld [vmem:[#allocation2 + $0x4a] sm:$0xff]  ;;  %v461_v40 = vld [vmem:[#allocation2 + $0x52] sm:$0xff]  ;;  %689 = vst.msk [vmem:[%s1049_s27 + $0x1e8] sm:$0xff] %vm232_vm6, %v346_v38  ;;  %271 = vrot.lane.b32.xlu1 %v231_v37, %s892_s28 }
  0xc4   : > { %712 = vst.msk [vmem:[%s1049_s27 + $0x210] sm:$0xff] %vm232_vm6, %v460_v39  ;;  %713 = vst.msk [vmem:[%s1049_s27 + $0x218] sm:$0xff] %vm232_vm6, %v461_v40 }
  0xc6   : > { %306 = vrot.lane.b32.xlu0 %v1047_v15, %s893_s29 }
  0xc7   : > { %308 = vrot.lane.b32.xlu1 %v225_v25, %s893_s29 }
  0xca   : > { %310 = vrot.lane.b32.xlu0 %v1043_v13, %s893_s29 }
  0xcb   : > { %312 = vrot.lane.b32.xlu1 %v227_v19, %s893_s29 }
  0xce   : > { %314 = vrot.lane.b32.xlu0 %v228_v29, %s893_s29 }
  0xcf   : > { %316 = vrot.lane.b32.xlu1 %v229_v31, %s893_s29 }
  0xd2   : > { %318 = vrot.lane.b32.xlu0 %v230_v35, %s893_s29 }
  0xd3   : > { %320 = vrot.lane.b32.xlu1 %v231_v37, %s893_s29 }
  0xd6   : > { %372 = vrot.lane.b32.xlu0 %v1060_v18, %s892_s28 }
  0xd7   : > { %374 = vrot.lane.b32.xlu1 %v340_v26, %s892_s28 }
  0xda   : > { %376 = vrot.lane.b32.xlu0 %v1045_v14, %s892_s28 }
  0xdb   : > { %378 = vrot.lane.b32.xlu1 %v1069_v20, %s892_s28 }
  0xde   : > { %380 = vrot.lane.b32.xlu0 %v343_v30, %s892_s28 }
  0xdf   : > { %382 = vrot.lane.b32.xlu1 %v344_v32, %s892_s28 }
  0xe2   : > { %384 = vrot.lane.b32.xlu0 %v345_v36, %s892_s28 }
  0xe3   : > { %386 = vrot.lane.b32.xlu1 %v346_v38, %s892_s28 }
  0xe6   : > { %421 = vrot.lane.b32.xlu0 %v1060_v18, %s893_s29 }
  0xe7   : > { %423 = vrot.lane.b32.xlu1 %v340_v26, %s893_s29 }
  0xea   : > { %425 = vrot.lane.b32.xlu0 %v1045_v14, %s893_s29 }
  0xeb   : > { %427 = vrot.lane.b32.xlu1 %v1069_v20, %s893_s29 }
  0xee   : > { %429 = vrot.lane.b32.xlu0 %v343_v30, %s893_s29 }
  0xef   : > { %431 = vrot.lane.b32.xlu1 %v344_v32, %s893_s29 }
  0xf2   : > { %433 = vrot.lane.b32.xlu0 %v345_v36, %s893_s29 }
  0xf3   : > { %435 = vrot.lane.b32.xlu1 %v346_v38, %s893_s29 }
  0xf6   : > { %487 = vrot.lane.b32.xlu0 %v1094_v27, %s892_s28 }
  0xf7   : > { %489 = vrot.lane.b32.xlu1 %v1096_v28, %s892_s28 }
  0xfa   : > { %491 = vrot.lane.b32.xlu0 %v1071_v21, %s892_s28 }
  0xfb   : > { %493 = vrot.lane.b32.xlu1 %v1078_v24, %s892_s28 }
  0xfe   : > { %495 = vrot.lane.b32.xlu0 %v458_v33, %s892_s28 }
  0xff   : > { %497 = vrot.lane.b32.xlu1 %v459_v34, %s892_s28 }
 0x102   : > { %499 = vrot.lane.b32.xlu0 %v460_v39, %s892_s28 }
 0x103   : > { %501 = vrot.lane.b32.xlu1 %v461_v40, %s892_s28 }
 0x106   : > { %536 = vrot.lane.b32.xlu0 %v1094_v27, %s893_s29 }
 0x107   : > { %538 = vrot.lane.b32.xlu1 %v1096_v28, %s893_s29 }
 0x10a   : > { %540 = vrot.lane.b32.xlu0 %v1071_v21, %s893_s29 }
 0x10b   : > { %542 = vrot.lane.b32.xlu1 %v1078_v24, %s893_s29 }
 0x10e   : > { %544 = vrot.lane.b32.xlu0 %v458_v33, %s893_s29 }
 0x10f   : > { %546 = vrot.lane.b32.xlu1 %v459_v34, %s893_s29 }
 0x112   : > { %548 = vrot.lane.b32.xlu0 %v460_v39, %s893_s29 }
 0x113   : > { %550 = vrot.lane.b32.xlu1 %v461_v40, %s893_s29 }
 0x125   : > { %v258_v41 = vpop.permute.xlu0 %257 }
 0x126   : > { %666 = vst.msk [vmem:[%s1049_s27 + $0x10] sm:$0xff] %vm232_vm6, %v258_v41 }
 0x129   : > { %v262_v42 = vpop.permute.xlu0 %261  ;;  %v260_v43 = vpop.permute.xlu1 %259 }
 0x12a   : > { %668 = vst.msk [vmem:[%s1049_s27 + $0xa0] sm:$0xff] %vm232_vm6, %v262_v42  ;;  %667 = vst.msk [vmem:[%s1049_s27 + $0x18] sm:$0xff] %vm232_vm6, %v260_v43 }
 0x12d   : > { %v264_v45 = vpop.permute.xlu1 %263 }
 0x12e   : > { %669 = vst.msk [vmem:[%s1049_s27 + $0xa8] sm:$0xff] %vm232_vm6, %v264_v45 }
 0x12f   : > { %v266_v44 = vpop.permute.xlu0 %265 }
 0x130   : > { %670 = vst.msk [vmem:[%s1049_s27 + $0x130] sm:$0xff] %vm232_vm6, %v266_v44 }
 0x131   : > { %v268_v47 = vpop.permute.xlu1 %267 }
 0x132   : > { %671 = vst.msk [vmem:[%s1049_s27 + $0x138] sm:$0xff] %vm232_vm6, %v268_v47 }
 0x134   : > { %v270_v46 = vpop.permute.xlu0 %269 }
 0x135   : > { %672 = vst.msk [vmem:[%s1049_s27 + $0x1c0] sm:$0xff] %vm232_vm6, %v270_v46  ;;  %v272_v49 = vpop.permute.xlu1 %271 }
 0x136   : > { %673 = vst.msk [vmem:[%s1049_s27 + $0x1c8] sm:$0xff] %vm232_vm6, %v272_v49 }
 0x138   : > { %v307_v48 = vpop.permute.xlu0 %306 }
 0x139   : > { %674 = vst.msk [vmem:[%s1049_s27 + $0x20] sm:$0xff] %vm232_vm6, %v307_v48  ;;  %v309_v51 = vpop.permute.xlu1 %308 }
 0x13a   : > { %675 = vst.msk [vmem:[%s1049_s27 + $0x28] sm:$0xff] %vm232_vm6, %v309_v51 }
 0x13c   : > { %v311_v50 = vpop.permute.xlu0 %310 }
 0x13d   : > { %676 = vst.msk [vmem:[%s1049_s27 + $0xb0] sm:$0xff] %vm232_vm6, %v311_v50  ;;  %v313_v53 = vpop.permute.xlu1 %312 }
 0x13e   : > { %677 = vst.msk [vmem:[%s1049_s27 + $0xb8] sm:$0xff] %vm232_vm6, %v313_v53 }
 0x140   : > { %v315_v52 = vpop.permute.xlu0 %314 }
 0x141   : > { %678 = vst.msk [vmem:[%s1049_s27 + $0x140] sm:$0xff] %vm232_vm6, %v315_v52  ;;  %v317_v55 = vpop.permute.xlu1 %316 }
 0x142   : > { %679 = vst.msk [vmem:[%s1049_s27 + $0x148] sm:$0xff] %vm232_vm6, %v317_v55 }
 0x144   : > { %v319_v54 = vpop.permute.xlu0 %318 }
 0x145   : > { %680 = vst.msk [vmem:[%s1049_s27 + $0x1d0] sm:$0xff] %vm232_vm6, %v319_v54  ;;  %v321_v57 = vpop.permute.xlu1 %320 }
 0x146   : > { %681 = vst.msk [vmem:[%s1049_s27 + $0x1d8] sm:$0xff] %vm232_vm6, %v321_v57 }
 0x148   : > { %v373_v56 = vpop.permute.xlu0 %372 }
 0x149   : > { %690 = vst.msk [vmem:[%s1049_s27 + $0x40] sm:$0xff] %vm232_vm6, %v373_v56  ;;  %v375_v59 = vpop.permute.xlu1 %374 }
 0x14a   : > { %691 = vst.msk [vmem:[%s1049_s27 + $0x48] sm:$0xff] %vm232_vm6, %v375_v59 }
 0x14c   : > { %v377_v58 = vpop.permute.xlu0 %376 }
 0x14d   : > { %692 = vst.msk [vmem:[%s1049_s27 + $0xd0] sm:$0xff] %vm232_vm6, %v377_v58  ;;  %v379_v61 = vpop.permute.xlu1 %378 }
 0x14e   : > { %693 = vst.msk [vmem:[%s1049_s27 + $0xd8] sm:$0xff] %vm232_vm6, %v379_v61 }
 0x150   : > { %v381_v60 = vpop.permute.xlu0 %380 }
 0x151   : > { %694 = vst.msk [vmem:[%s1049_s27 + $0x160] sm:$0xff] %vm232_vm6, %v381_v60  ;;  %v383_v63 = vpop.permute.xlu1 %382 }
 0x152   : > { %695 = vst.msk [vmem:[%s1049_s27 + $0x168] sm:$0xff] %vm232_vm6, %v383_v63 }
 0x154   : > { %v385_v62 = vpop.permute.xlu0 %384 }
 0x155   : > { %696 = vst.msk [vmem:[%s1049_s27 + $0x1f0] sm:$0xff] %vm232_vm6, %v385_v62  ;;  %v387_v1 = vpop.permute.xlu1 %386 }
 0x156   : > { %697 = vst.msk [vmem:[%s1049_s27 + $0x1f8] sm:$0xff] %vm232_vm6, %v387_v1 }
 0x158   : > { %v422_v0 = vpop.permute.xlu0 %421 }
 0x159   : > { %698 = vst.msk [vmem:[%s1049_s27 + $0x50] sm:$0xff] %vm232_vm6, %v422_v0  ;;  %v424_v3 = vpop.permute.xlu1 %423 }
 0x15a   : > { %699 = vst.msk [vmem:[%s1049_s27 + $0x58] sm:$0xff] %vm232_vm6, %v424_v3 }
 0x15c   : > { %v426_v2 = vpop.permute.xlu0 %425 }
 0x15d   : > { %700 = vst.msk [vmem:[%s1049_s27 + $0xe0] sm:$0xff] %vm232_vm6, %v426_v2  ;;  %v428_v5 = vpop.permute.xlu1 %427 }
 0x15e   : > { %701 = vst.msk [vmem:[%s1049_s27 + $0xe8] sm:$0xff] %vm232_vm6, %v428_v5 }
 0x160   : > { %v430_v4 = vpop.permute.xlu0 %429 }
 0x161   : > { %702 = vst.msk [vmem:[%s1049_s27 + $0x170] sm:$0xff] %vm232_vm6, %v430_v4  ;;  %v432_v7 = vpop.permute.xlu1 %431 }
 0x162   : > { %703 = vst.msk [vmem:[%s1049_s27 + $0x178] sm:$0xff] %vm232_vm6, %v432_v7 }
 0x164   : > { %v434_v6 = vpop.permute.xlu0 %433 }
 0x165   : > { %704 = vst.msk [vmem:[%s1049_s27 + $0x200] sm:$0xff] %vm232_vm6, %v434_v6  ;;  %v436_v9 = vpop.permute.xlu1 %435 }
 0x166   : > { %705 = vst.msk [vmem:[%s1049_s27 + $0x208] sm:$0xff] %vm232_vm6, %v436_v9 }
 0x168   : > { %v488_v8 = vpop.permute.xlu0 %487 }
 0x169   : > { %714 = vst.msk [vmem:[%s1049_s27 + $0x70] sm:$0xff] %vm232_vm6, %v488_v8  ;;  %v490_v11 = vpop.permute.xlu1 %489 }
 0x16a   : > { %715 = vst.msk [vmem:[%s1049_s27 + $0x78] sm:$0xff] %vm232_vm6, %v490_v11 }
 0x16c   : > { %v492_v10 = vpop.permute.xlu0 %491 }
 0x16d   : > { %716 = vst.msk [vmem:[%s1049_s27 + $0x100] sm:$0xff] %vm232_vm6, %v492_v10  ;;  %v494_v13 = vpop.permute.xlu1 %493 }
 0x16e   : > { %717 = vst.msk [vmem:[%s1049_s27 + $0x108] sm:$0xff] %vm232_vm6, %v494_v13 }
 0x170   : > { %v496_v12 = vpop.permute.xlu0 %495 }
 0x171   : > { %718 = vst.msk [vmem:[%s1049_s27 + $0x190] sm:$0xff] %vm232_vm6, %v496_v12  ;;  %v498_v15 = vpop.permute.xlu1 %497 }
 0x172   : > { %719 = vst.msk [vmem:[%s1049_s27 + $0x198] sm:$0xff] %vm232_vm6, %v498_v15 }
 0x174   : > { %v500_v14 = vpop.permute.xlu0 %499 }
 0x175   : > { %720 = vst.msk [vmem:[%s1049_s27 + $0x220] sm:$0xff] %vm232_vm6, %v500_v14  ;;  %v502_v17 = vpop.permute.xlu1 %501 }
 0x176   : > { %721 = vst.msk [vmem:[%s1049_s27 + $0x228] sm:$0xff] %vm232_vm6, %v502_v17 }
 0x178   : > { %v537_v16 = vpop.permute.xlu0 %536 }
 0x179   : > { %722 = vst.msk [vmem:[%s1049_s27 + $0x80] sm:$0xff] %vm232_vm6, %v537_v16  ;;  %v539_v19 = vpop.permute.xlu1 %538 }
 0x17a   : > { %723 = vst.msk [vmem:[%s1049_s27 + $0x88] sm:$0xff] %vm232_vm6, %v539_v19 }
 0x17c   : > { %v541_v18 = vpop.permute.xlu0 %540 }
 0x17d   : > { %724 = vst.msk [vmem:[%s1049_s27 + $0x110] sm:$0xff] %vm232_vm6, %v541_v18  ;;  %v543_v21 = vpop.permute.xlu1 %542 }
 0x17e   : > { %725 = vst.msk [vmem:[%s1049_s27 + $0x118] sm:$0xff] %vm232_vm6, %v543_v21 }
 0x180   : > { %v545_v20 = vpop.permute.xlu0 %544 }
 0x181   : > { %726 = vst.msk [vmem:[%s1049_s27 + $0x1a0] sm:$0xff] %vm232_vm6, %v545_v20  ;;  %v547_v23 = vpop.permute.xlu1 %546 }
 0x182   : > { %727 = vst.msk [vmem:[%s1049_s27 + $0x1a8] sm:$0xff] %vm232_vm6, %v547_v23 }
 0x184   : > { %v549_v22 = vpop.permute.xlu0 %548 }
 0x185   : > { %728 = vst.msk [vmem:[%s1049_s27 + $0x230] sm:$0xff] %vm232_vm6, %v549_v22  ;;  %v551_v24 = vpop.permute.xlu1 %550 }
 0x186   : > { %729 = vst.msk [vmem:[%s1049_s27 + $0x238] sm:$0xff] %vm232_vm6, %v551_v24 }
 0x187   : > { %834 = shalt.err (!%p831_p10)
}
 0x188   : > { %s835_s21 = scalar_lea.hbm %s1289_s11, 9216  ;;  %s839_s26 = scalar_lea.hbm %s1337_s1, 18432 }
 0x189   : > { %p836_p0 = scmp.ne.s32.totalorder %s1289_s11, %s835_s21  ;;  %p840_p1 = scmp.lt.s32.totalorder %s1289_s11, %s1337_s1 }
 0x18a   : > { %p841_p3 = scmp.lt.s32.totalorder %s839_s26, %s835_s21 }
 0x18b   : > { %p837_p2 = pnand %p836_p0, %p1346_p12 }
 0x18c   : > { %p842_p6 = por %p841_p3, %p840_p1 }
 0x18d   : > { %p838_p9 = pneg %p837_p2 }
 0x18f   : > { %p843_p11 = pnand %p842_p6, %p838_p9 }
 0x191   : > { %846 = shalt.err (!%p843_p11)
}
 0x192   : > { %s895_s25 = smov 128   ;;  %s896_s27 = smov 8  }
 0x193   : > { %741 = dma.vmem_to_hbm [thread:$0]  (%p1346_p12), %s1291_s3, 9216, %s1289_s11, %s570_s10, %s895_s25, %s895_s25, %s896_s27  }
 0x194 PF: > { %s599_s28 = sand.u32 1, %s873_s6   ;;  %p1347_p13 = scmp.ne.s32.totalorder %s1343_s19, 0 }
 0x195   : > { %p1348_p4 = scmp.ge.s32.totalorder %s885_s9, 2  ;;  %s600_s29 = scalar_lea.sflag [#allocation5], %s599_s28 }
 0x197   : > { %p748_p5 = pnand %p1348_p4, %p1347_p13 }
 0x199   : > { %p749_p7 = pneg %p748_p5 }
 0x19b   : > { %868 = dma.done.wait (%p749_p7), %s600_s29, 9216  }
 0x19c   : > { %870 = vsyncadd (%p749_p7), %s600_s29, 4294958080  ;;  %p14_p8 = scmp.ge.s32.totalorder %s932_s12, 4   ;;  %s1349_s6 = smov %s877_s7 }
 0x19d   : > { %s1350_s7 = smov %s881_s8  ;;  %s1351_s8 = smov %s944_s15 }
 0x19e   : > { %s1352_s9 = smov %s932_s12  ;;  %16 = sbr.rel (!%p14_p8) target bundleno = 5 (0x5), region = 77 }
 0x1a3   :  { %605 = vsyncpa [#allocation4], 1 }
 0x1a4   :  { %607 = vsyncpa [#allocation4 + $0x1], 1 }
 0x1a5   :  { %608 = vsyncpa [#allocation5], 1 }
 0x1a6   :  { %610 = vsyncpa [#allocation5 + $0x1], 1 }

</bundles_post_ra>
